<compile_context>
chip_gen: v7x
topology: tpu7x:2x2x1
jax: 0.10.0
libtpu: 0.0.40
codegen_flags: <defaults>
</compile_context>

<pallas_src>
import jax
import jax.numpy as jnp
from jax.experimental import pallas as pl
from jax.experimental.pallas import tpu as pltpu


def _discriminator_kernel(x_ref, a_ref, w1x_ref, w1a_ref, b1_ref,
                          w2_ref, b2_ref, out_ref):
    # Fused concat: cat @ W1 == x @ W1x + a @ W1a   (MXU, f32 accumulation)
    h = (jnp.dot(x_ref[...], w1x_ref[...], preferred_element_type=jnp.float32)
         + jnp.dot(a_ref[...], w1a_ref[...], preferred_element_type=jnp.float32)
         + b1_ref[...])
    h = jnp.maximum(h, 0.0)
    # Second layer has a single output unit: do it on the VPU/XLU
    # (broadcast-mul + row reduce) instead of a 1-wide MXU matmul.
    logits = jnp.sum(h * w2_ref[...], axis=-1, keepdims=True) + b2_ref[...]
    out_ref[...] = jax.nn.sigmoid(logits).astype(out_ref.dtype)
    # TODO(synk): output last dim is 1 -> masked vst; a lane-dense
    # (tile/128, 128) output slab would shave a bit more off the store path.


def discriminator_forward(x, a, w1, b1, w2, b2, *, tile_b=8192):
    """x: (B, state_dim), a: (B, action_dim).
    w1: (state_dim+action_dim, hidden), b1: (hidden,)
    w2: (hidden, 1), b2: (1,)
    Returns sigmoid probs of shape (B, 1)."""
    B, state_dim = x.shape
    action_dim = a.shape[1]
    hidden = w1.shape[1]

    # Split W1 so the concat never materializes in HBM.
    w1x = w1[:state_dim, :]
    w1a = w1[state_dim:, :]
    b1_2d = b1.reshape(1, hidden)
    w2_row = w2.reshape(1, hidden)   # (hidden, 1) -> row vector for VPU reduce
    b2_2d = b2.reshape(1, 1)

    # Batch tile: multiple of 8 (sublane); large tiles amortize per-step cost.
    if B >= tile_b:
        tile = tile_b
    else:
        tile = max(8, -(-B // 8) * 8)
    padded_B = -(-B // tile) * tile
    if padded_B != B:
        pad = padded_B - B
        x_p = jnp.pad(x, ((0, pad), (0, 0)))
        a_p = jnp.pad(a, ((0, pad), (0, 0)))
    else:
        x_p, a_p = x, a

    grid = (padded_B // tile,)
    out = pl.pallas_call(
        _discriminator_kernel,
        out_shape=jax.ShapeDtypeStruct((padded_B, 1), jnp.float32),
        grid_spec=pltpu.PrefetchScalarGridSpec(
            num_scalar_prefetch=0,
            grid=grid,
            in_specs=[
                # batch-tiled activations (double-buffered by Pallas)
                pl.BlockSpec((tile, state_dim), lambda i: (i, 0)),
                pl.BlockSpec((tile, action_dim), lambda i: (i, 0)),
                # weights/biases: same block every step -> stay VMEM-resident
                pl.BlockSpec((state_dim, hidden), lambda i: (0, 0)),
                pl.BlockSpec((action_dim, hidden), lambda i: (0, 0)),
                pl.BlockSpec((1, hidden), lambda i: (0, 0)),
                pl.BlockSpec((1, hidden), lambda i: (0, 0)),
                pl.BlockSpec((1, 1), lambda i: (0, 0)),
            ],
            out_specs=pl.BlockSpec((tile, 1), lambda i: (i, 0)),
        ),
        compiler_params=pltpu.CompilerParams(
            dimension_semantics=("parallel",)),
    )(x_p, a_p, w1x, w1a, b1_2d, w2_row, b2_2d)
    return out[:B]


def _ref_forward(x, a, w1, b1, w2, b2):
    cat = jnp.concatenate([x, a], axis=1)
    h = jax.nn.relu(cat @ w1 + b1)
    return jax.nn.sigmoid(h @ w2 + b2)


def _make_params(key, state_dim, action_dim, hidden_dim):
    kw1, kb1, kw2, kb2 = jax.random.split(key, 4)
    in1 = state_dim + action_dim
    bound1 = 1.0 / jnp.sqrt(in1)
    w1 = jax.random.uniform(kw1, (in1, hidden_dim), minval=-bound1,
                            maxval=bound1, dtype=jnp.float32)
    b1 = jax.random.uniform(kb1, (hidden_dim,), minval=-bound1,
                            maxval=bound1, dtype=jnp.float32)
    bound2 = 1.0 / jnp.sqrt(hidden_dim)
    w2 = jax.random.uniform(kw2, (hidden_dim, 1), minval=-bound2,
                            maxval=bound2, dtype=jnp.float32)
    b2 = jax.random.uniform(kb2, (1,), minval=-bound2,
                            maxval=bound2, dtype=jnp.float32)
    return w1, b1, w2, b2


if __name__ == "__main__":
    state_dim, action_dim, hidden_dim = 4, 2, 32
    batch = 2

    key = jax.random.PRNGKey(0)
    kx, ka, kp, kx2, ka2 = jax.random.split(key, 5)

    w1, b1, w2, b2 = _make_params(kp, state_dim, action_dim, hidden_dim)

    # ---- small case (batch=2, single grid step, padded to 8 rows) ----
    x = jax.random.normal(kx, (batch, state_dim), dtype=jnp.float32)
    a = jax.random.normal(ka, (batch, action_dim), dtype=jnp.float32)

    out = discriminator_forward(x, a, w1, b1, w2, b2)
    jax.block_until_ready(out)
    ref = _ref_forward(x, a, w1, b1, w2, b2)
    assert out.shape == (batch, 1)
    assert jnp.allclose(out, ref, atol=1e-5, rtol=1e-5)

    # ---- multi-tile case (exercises grid, padding, resident weights) ----
    big_batch = 300
    xb = jax.random.normal(kx2, (big_batch, state_dim), dtype=jnp.float32)
    ab = jax.random.normal(ka2, (big_batch, action_dim), dtype=jnp.float32)
    out_b = discriminator_forward(xb, ab, w1, b1, w2, b2, tile_b=128)
    jax.block_until_ready(out_b)
    ref_b = _ref_forward(xb, ab, w1, b1, w2, b2)
    assert out_b.shape == (big_batch, 1)
    assert jnp.allclose(out_b, ref_b, atol=1e-5, rtol=1e-5)

    print("KERNEL_OK")
</pallas_src>

<mosaic_0001>
module attributes {stable_mosaic.version = 11 : i64} {
  func.func @_discriminator_kernel(%arg0: i32, %arg1: memref<8x4xf32, #tpu.memory_space<vmem>>, %arg2: memref<8x2xf32, #tpu.memory_space<vmem>>, %arg3: memref<4x32xf32, #tpu.memory_space<vmem>>, %arg4: memref<2x32xf32, #tpu.memory_space<vmem>>, %arg5: memref<1x32xf32, #tpu.memory_space<vmem>>, %arg6: memref<1x32xf32, #tpu.memory_space<vmem>>, %arg7: memref<1x1xf32, #tpu.memory_space<vmem>>, %arg8: memref<8x1xf32, #tpu.memory_space<vmem>>) attributes {dimension_semantics = [#tpu.dimension_semantics<parallel>], iteration_bounds = array<i64: 1>, scalar_prefetch = 0 : i64, scratch_operands = 0 : i64, tpu.core_type = #tpu.core_type<tc>, window_params = [{transform_indices = @transform_0, window_bounds = array<i64: 8, 4>}, {transform_indices = @transform_1, window_bounds = array<i64: 8, 2>}, {pipeline_mode = #tpu.pipeline_mode<synchronous>, transform_indices = @transform_2, window_bounds = array<i64: 4, 32>}, {pipeline_mode = #tpu.pipeline_mode<synchronous>, transform_indices = @transform_3, window_bounds = array<i64: 2, 32>}, {pipeline_mode = #tpu.pipeline_mode<synchronous>, transform_indices = @transform_4, window_bounds = array<i64: 1, 32>}, {pipeline_mode = #tpu.pipeline_mode<synchronous>, transform_indices = @transform_5, window_bounds = array<i64: 1, 32>}, {pipeline_mode = #tpu.pipeline_mode<synchronous>, transform_indices = @transform_6, window_bounds = array<i64: 1, 1>}, {transform_indices = @transform_7, window_bounds = array<i64: 8, 1>}]} {
    %c0 = arith.constant 0 : index
    %c0_0 = arith.constant 0 : index
    %0 = vector.load %arg1[%c0, %c0_0] : memref<8x4xf32, #tpu.memory_space<vmem>>, vector<8x4xf32>
    %c0_1 = arith.constant 0 : index
    %c0_2 = arith.constant 0 : index
    %1 = vector.load %arg3[%c0_1, %c0_2] : memref<4x32xf32, #tpu.memory_space<vmem>>, vector<4x32xf32>
    %cst = arith.constant dense<0.000000e+00> : vector<8x32xf32>
    %2 = tpu.matmul %0, %1, %cst {dimension_numbers = #tpu.dot_dimension_numbers<[1], [0], [0], [1], [0, 0, 1, 1], [], []>} : vector<8x4xf32>, vector<4x32xf32>, vector<8x32xf32> -> vector<8x32xf32>
    %c0_3 = arith.constant 0 : index
    %c0_4 = arith.constant 0 : index
    %3 = vector.load %arg2[%c0_3, %c0_4] : memref<8x2xf32, #tpu.memory_space<vmem>>, vector<8x2xf32>
    %c0_5 = arith.constant 0 : index
    %c0_6 = arith.constant 0 : index
    %4 = vector.load %arg4[%c0_5, %c0_6] : memref<2x32xf32, #tpu.memory_space<vmem>>, vector<2x32xf32>
    %cst_7 = arith.constant dense<0.000000e+00> : vector<8x32xf32>
    %5 = tpu.matmul %3, %4, %cst_7 {dimension_numbers = #tpu.dot_dimension_numbers<[1], [0], [0], [1], [0, 0, 1, 1], [], []>} : vector<8x2xf32>, vector<2x32xf32>, vector<8x32xf32> -> vector<8x32xf32>
    %6 = arith.addf %2, %5 : vector<8x32xf32>
    %c0_8 = arith.constant 0 : index
    %c0_9 = arith.constant 0 : index
    %7 = vector.load %arg5[%c0_8, %c0_9] : memref<1x32xf32, #tpu.memory_space<vmem>>, vector<1x32xf32>
    %8 = vector.broadcast %7 : vector<1x32xf32> to vector<8x32xf32>
    %9 = arith.addf %6, %8 : vector<8x32xf32>
    %cst_10 = arith.constant 0.000000e+00 : f32
    %10 = vector.broadcast %cst_10 : f32 to vector<8x32xf32>
    %11 = arith.maximumf %9, %10 : vector<8x32xf32>
    %c0_11 = arith.constant 0 : index
    %c0_12 = arith.constant 0 : index
    %12 = vector.load %arg6[%c0_11, %c0_12] : memref<1x32xf32, #tpu.memory_space<vmem>>, vector<1x32xf32>
    %13 = vector.broadcast %12 : vector<1x32xf32> to vector<8x32xf32>
    %14 = arith.mulf %11, %13 : vector<8x32xf32>
    %cst_13 = arith.constant dense<0.000000e+00> : vector<8xf32>
    %15 = vector.multi_reduction <add>, %14, %cst_13 [1] : vector<8x32xf32> to vector<8xf32>
    %16 = vector.shape_cast %15 : vector<8xf32> to vector<8x1xf32>
    %c0_14 = arith.constant 0 : index
    %c0_15 = arith.constant 0 : index
    %17 = vector.load %arg7[%c0_14, %c0_15] : memref<1x1xf32, #tpu.memory_space<vmem>>, vector<1x1xf32>
    %18 = vector.broadcast %17 : vector<1x1xf32> to vector<8x1xf32>
    %19 = arith.addf %16, %18 : vector<8x1xf32>
    %20 = arith.negf %19 : vector<8x1xf32>
    %21 = math.exp %20 : vector<8x1xf32>
    %cst_16 = arith.constant 1.000000e+00 : f32
    %22 = vector.broadcast %cst_16 : f32 to vector<8x1xf32>
    %23 = arith.addf %22, %21 : vector<8x1xf32>
    %24 = arith.divf %22, %23 : vector<8x1xf32>
    %c0_17 = arith.constant 0 : index
    %c0_18 = arith.constant 0 : index
    %25 = vector.load %arg8[%c0_17, %c0_18] : memref<8x1xf32, #tpu.memory_space<vmem>>, vector<8x1xf32>
    tpu.vector_store %arg8[%c0_17, %c0_18], %24 {strides = array<i32>} : memref<8x1xf32, #tpu.memory_space<vmem>>, vector<8x1xf32>,
    return
  }
  func.func @transform_0(%arg0: i32) -> (i32, i32) {
    %c0_i32 = arith.constant 0 : i32
    %c0_i32_0 = arith.constant 0 : i32
    return %arg0, %c0_i32 : i32, i32
  }
  func.func @transform_1(%arg0: i32) -> (i32, i32) {
    %c0_i32 = arith.constant 0 : i32
    %c0_i32_0 = arith.constant 0 : i32
    return %arg0, %c0_i32 : i32, i32
  }
  func.func @transform_2(%arg0: i32) -> (i32, i32) {
    %c0_i32 = arith.constant 0 : i32
    %c0_i32_0 = arith.constant 0 : i32
    %c0_i32_1 = arith.constant 0 : i32
    return %c0_i32, %c0_i32_0 : i32, i32
  }
  func.func @transform_3(%arg0: i32) -> (i32, i32) {
    %c0_i32 = arith.constant 0 : i32
    %c0_i32_0 = arith.constant 0 : i32
    %c0_i32_1 = arith.constant 0 : i32
    return %c0_i32, %c0_i32_0 : i32, i32
  }
  func.func @transform_4(%arg0: i32) -> (i32, i32) {
    %c0_i32 = arith.constant 0 : i32
    %c0_i32_0 = arith.constant 0 : i32
    %c0_i32_1 = arith.constant 0 : i32
    return %c0_i32, %c0_i32_0 : i32, i32
  }
  func.func @transform_5(%arg0: i32) -> (i32, i32) {
    %c0_i32 = arith.constant 0 : i32
    %c0_i32_0 = arith.constant 0 : i32
    %c0_i32_1 = arith.constant 0 : i32
    return %c0_i32, %c0_i32_0 : i32, i32
  }
  func.func @transform_6(%arg0: i32) -> (i32, i32) {
    %c0_i32 = arith.constant 0 : i32
    %c0_i32_0 = arith.constant 0 : i32
    %c0_i32_1 = arith.constant 0 : i32
    return %c0_i32, %c0_i32_0 : i32, i32
  }
  func.func @transform_7(%arg0: i32) -> (i32, i32) {
    %c0_i32 = arith.constant 0 : i32
    %c0_i32_0 = arith.constant 0 : i32
    return %arg0, %c0_i32 : i32, i32
  }
}

</mosaic_0001>

<bundles_post_ra>
// kernel: tpu_custom_call.1
= control target key start
LH: loop header
LB: loop body
LE: loop exit
PB: predicated region body
PF: predicated region fallthrough
CT: control target
= control target key end

     0   :  { %vm36_vm0 = vcmask 1041408   ;;  %vm114_vm1 = vcmask 1043456   ;;  %v257_v0 = vmov 0.0   ;;  %vm32_vm2 = vcmask 15360   ;;  %s323_s3 = inlined_call_operand.vmem [shape: f32[2,32], index: 3, kind: input, shape index: {}]   ;;  %s324_s2 = inlined_call_operand.vmem [shape: f32[4,32], index: 2, kind: input, shape index: {}]   ;;  %s325_s1 = inlined_call_operand.vmem [shape: f32[8,2], index: 1, kind: input, shape index: {}]   ;;  %s326_s0 = inlined_call_operand.vmem [shape: f32[8,4], index: 0, kind: input, shape index: {}]   ;;  %s327_s6 = inlined_call_operand.<no memory space> [shape: f32[1,1], index: 6, kind: input, shape index: {}]   ;;  %s328_s4 = inlined_call_operand.vmem [shape: f32[1,32], index: 4, kind: input, shape index: {}]   ;;  %s329_s5 = inlined_call_operand.vmem [shape: f32[1,32], index: 5, kind: input, shape index: {}]   ;;  %s330_s7 = inlined_call_operand.vmem [shape: f32[8,1], index: 7, kind: output, shape index: {}]  }
   0x1   :  { %241 = vmatprep.subr.mxu0 %v257_v0  ;;  %246 = vmatprep.subr.mxu1 %v257_v0  ;;  %v31_v1 = vld [vmem:[%s323_s3] sm:$0x3]  ;;  %vm258_vm3 = vmmov 0   ;;  %vm110_vm4 = vcmask 31744   ;;  %v12_v5 = vstv %s327_s6  ;;  %vm205_vm5 = vcmask 261120  }
   0x2   :  { %v29_v2 = vld [vmem:[%s324_s2] sm:$0xf]  ;;  %242 = vmatpush3.msk.msra.mxu0 %vm36_vm0, %v31_v1  ;;  %243 = vmatprep.mubr.msk.f32.mxu0 %vm258_vm3, %v257_v0  ;;  %13 = vst [vmem:[#allocation2] sm:$0x1] %v12_v5  ;;  %vm223_vm6 = vcmask 7168  }
   0x3   :  { %v30_v3 = vld [vmem:[%s325_s1] sm:$0xff]  ;;  %247 = vmatpush3.msk.msra.mxu1 %vm114_vm1, %v29_v2  ;;  %248 = vmatprep.mubr.msk.f32.mxu1 %vm258_vm3, %v257_v0 }
   0x4   :  { %v28_v4 = vld [vmem:[%s326_s0] sm:$0xff]  ;;  %244 = vmatmul.mubr.msk.f32.vlgmr.msra.gmra.mrb[0].mxu0 %vm32_vm2, %v30_v3 }
   0x5   :  { %249 = vmatmul.mubr.msk.f32.vlgmr.msra.gmra.mrb[0].mxu1 %vm110_vm4, %v28_v4  ;;  %v233_v8 = vld [vmem:[%s328_s4] ss:$0 sm:$0xff] }
   0x6   :  { %v234_v13 = vld [vmem:[%s329_s5] ss:$0 sm:$0xff] }
   0x9   :  { %v235_v17 = vld [vmem:[#allocation2] ss:$0 sm:$0xff] }
  0xd7   :  { %v106_v6 = vpop.f32.mrb[0].mxu0 }
  0xd8   :  { %v184_v7 = vpop.f32.mrb[0].mxu1  ;;  %v245_v10 = vpop.f32.mrb[1].mxu0 }
  0xd9   :  { %v185_v9 = vadd.f32 %v184_v7, %v106_v6  ;;  %v250_v11 = vpop.f32.mrb[1].mxu1 }
  0xdb   :  { %v195_v12 = vadd.f32 %v233_v8, %v185_v9 }
  0xdd   :  { %v196_v14 = vmax.f32 %v195_v12, 0.0 }
  0xdf   :  { %v204_v15 = vmul.f32 %v234_v13, %v196_v14 }
  0xe1   :  { %v206_v16 = vsel %vm205_vm5, %v204_v15, 0.0 }
  0xe2   :  { %207 = vadd.xlane.f32.xlu0 %v206_v16 }
 0x16f   :  { %v208_v18 = vpop.xlane.xlu0 %207 }
 0x170   :  { %v216_v19 = vadd.f32 %v235_v17, %v208_v18 }
 0x172   :  { %v236_v20 = vmul.f32 -1.442695, %v216_v19 }
 0x174   :  { %253 = vpow2.f32 %v236_v20 }
 0x17e   :  { %v254_v21 = vpop.eup %253 }
 0x17f   :  { %v220_v22 = vadd.f32 1.0, %v254_v21 }
 0x181   :  { %255 = vrcp.f32 %v220_v22 }
 0x18b   :  { %v256_v23 = vpop.eup %255 }
 0x18c   :  { %224 = vst.msk [vmem:[%s330_s7] sm:$0xff] %vm223_vm6, %v256_v23 }

</bundles_post_ra>
